<compile_context>
chip_gen: v7x
topology: tpu7x:2x2x1
jax: 0.10.0
libtpu: 0.0.40
codegen_flags: <defaults>
</compile_context>

<pallas_src>
import functools
import math

import jax
import jax.numpy as jnp
from jax import lax
from jax.experimental import pallas as pl
from jax.experimental.pallas import tpu as pltpu


def _pair(v):
    return (v, v) if isinstance(v, int) else tuple(v)


def _round_up(x, m):
    return ((x + m - 1) // m) * m


_AUTO_SINGLE_BLOCK_BYTES = 4 * 1024 * 1024  # flat image below this -> one row band


# --------------------------------------------------------------------------------------
# Pallas kernels
# --------------------------------------------------------------------------------------
def _emit_block(cols, w_ref, b_ref, o_ref):
    # cols: list of (Cin, M) lane slices, one per (kh, kw) tap, in the same order as
    #       the rows of w_ref (Cout, kH*kW*Cin).
    patches = jnp.concatenate(cols, axis=0)                         # (K, M) im2col in VMEM
    acc = jnp.dot(w_ref[...], patches,
                  preferred_element_type=jnp.float32)               # single MXU matmul
    acc = acc + b_ref[...].astype(jnp.float32)                      # (Cout, 1) broadcast
    o_ref[0] = acc.astype(o_ref.dtype)                              # lane-dense store


def _convt_kernel_single(x_ref, w_ref, b_ref, o_ref, *, taps, M):
    # x_ref: (1, Cin, Lflat) whole flattened image; o_ref: (1, Cout, M).
    cols = [x_ref[0, :, off:off + M] for off in taps]               # static lane slices
    _emit_block(cols, w_ref, b_ref, o_ref)


def _convt_kernel_tiled(xm_ref, xh_ref, w_ref, b_ref, o_ref, *, taps, M, hneed):
    # xm_ref: (1, Cin, M) current row band; xh_ref: (1, Cin, M) next band (halo source).
    if hneed > 0:
        window = jnp.concatenate([xm_ref[0], xh_ref[0, :, :hneed]], axis=1)
    else:
        window = xm_ref[0]
    cols = [window[:, off:off + M] for off in taps]                 # static lane slices
    _emit_block(cols, w_ref, b_ref, o_ref)


# --------------------------------------------------------------------------------------
# Public wrapper
# --------------------------------------------------------------------------------------
@functools.partial(
    jax.jit,
    static_argnames=("stride", "padding", "dilation", "groups", "row_tile",
                     "compute_dtype"))
def convtranspose2d_same_padding(x, weight, bias=None, stride=(1, 1), padding=(1, 1),
                                 dilation=(1, 1), groups=1, *, row_tile=None,
                                 compute_dtype=None):
    """Exact re-implementation of the reference convtranspose2d_same_padding forward.

    x      : (N, Cin, H, W)                  NCHW, like torch
    weight : (Cin, Cout // groups, kH, kW)   torch conv_transpose layout
    bias   : (Cout,) or None
    """
    del padding  # like the reference, the "same" padding is recomputed below
    if groups != 1:
        # TODO(synk): grouped transposed convolution not implemented (module default is 1)
        raise NotImplementedError("groups != 1 not supported")

    s_h, s_w = _pair(stride)
    d_h, d_w = _pair(dilation)
    N, Cin, H, W = (int(v) for v in x.shape)
    kH, kW = int(weight.shape[2]), int(weight.shape[3])
    Cout = int(weight.shape[1]) * groups

    # --- replicate the reference "same"-padding math exactly (it derives BOTH spatial
    #     paddings from H / stride[0] / dilation[0]) ---
    out_rows = (H + s_h - 1) // s_h
    padding_rows = max(0, (out_rows - 1) * s_h + (kH - 1) * d_h + 1 - H)
    rows_odd = (padding_rows % 2) != 0
    padding_cols = padding_rows
    cols_odd = rows_odd
    p_h = padding_rows // 2
    p_w = padding_cols // 2
    Hi, Wi = H + int(rows_odd), W + int(cols_odd)

    halo_h = (kH - 1) * d_h
    halo_w = (kW - 1) * d_w
    Ph = halo_h - p_h
    Pw = halo_w - p_w
    if Ph < 0 or Pw < 0:
        # TODO(synk): negative effective padding (input crop) path not implemented
        raise NotImplementedError("padding larger than dilation*(kernel-1) not supported")

    Hp = (Hi - 1) * s_h + 1 + 2 * Ph            # rows of the equivalent stride-1 conv input
    Wp = (Wi - 1) * s_w + 1 + 2 * Pw
    Hout = Hp - halo_h
    Wout = Wp - halo_w

    cdt = jnp.dtype(compute_dtype) if compute_dtype is not None else jnp.dtype(x.dtype)
    itemsize = cdt.itemsize

    # --- row-band tiling plan (bounds the VMEM working set / gives both TCs work) ---
    th = None
    if row_tile is None:
        if Cin * (Hp + 1) * Wp * itemsize > _AUTO_SINGLE_BLOCK_BYTES:
            row_tile = 64
    if row_tile is not None:
        t = _round_up(max(int(row_tile), halo_h + 1, 8), 8)
        if t < Hout:
            th = t

    if th is None:
        # Single row band per image: every block equals the full array dims, so there
        # are no (8,128) alignment constraints and all slice offsets are static.
        P = Wp
        R = 1
        Hout_pad = Hout
        rows_buf = Hp + 1                       # +1 zero row = slack for the last tap's fringe
        M = Hout * P
        hneed = 0
    else:
        # Multi-band: pitch / band sizes chosen so every block is (8,128) aligned.
        P = _round_up(Wp, 16)
        R = -(-Hout // th)
        Hout_pad = R * th
        rows_buf = (R + 1) * th                 # trailing zero band doubles as the last halo
        M = th * P                              # lane extent of one block (multiple of 128)
        hneed = min(_round_up(halo_h * P + halo_w, 128), M)
        assert M % 128 == 0 and rows_buf >= Hp

    Lflat = rows_buf * P
    K = kH * kW * Cin

    # --- ONE fused pass: zero-insertion (stride) + all edge padding in a single scatter ---
    x_buf = jnp.zeros((N, Cin, rows_buf, P), cdt)
    x_buf = x_buf.at[:, :, Ph:Ph + (H - 1) * s_h + 1:s_h,
                           Pw:Pw + (W - 1) * s_w + 1:s_w].set(x.astype(cdt))
    x_flat = x_buf.reshape(N, Cin, Lflat)       # free: contiguous merge of minor dims

    # --- weight -> (Cout, kH*kW*Cin): flipped, channel-swapped, im2col-ordered ---
    w_hwio = jnp.transpose(weight[:, :, ::-1, ::-1], (2, 3, 0, 1))   # (kH, kW, Cin, Cout)
    w2 = jnp.transpose(w_hwio.reshape(K, Cout)).astype(cdt)          # (Cout, K)
    b = bias if bias is not None else jnp.zeros((Cout,), jnp.float32)
    b2 = b.reshape(Cout, 1).astype(jnp.float32)

    # static tap offsets into the flattened (row-pitch P) window
    taps = tuple(a * d_h * P + c * d_w for a in range(kH) for c in range(kW))

    if R == 1:
        kern = functools.partial(_convt_kernel_single, taps=taps, M=M)
        in_specs = [
            pl.BlockSpec((1, Cin, Lflat), lambda n, r: (n, 0, 0)),
            pl.BlockSpec((Cout, K), lambda n, r: (0, 0)),
            pl.BlockSpec((Cout, 1), lambda n, r: (0, 0)),
        ]
        operands = (x_flat, w2, b2)
    else:
        # TODO(synk): the halo spec re-fetches the full next band (simple & fully static);
        #             it could be narrowed to `hneed` lanes with a finer-grained block.
        kern = functools.partial(_convt_kernel_tiled, taps=taps, M=M, hneed=hneed)
        in_specs = [
            pl.BlockSpec((1, Cin, M), lambda n, r: (n, 0, r)),        # current band
            pl.BlockSpec((1, Cin, M), lambda n, r: (n, 0, r + 1)),    # next band (halo)
            pl.BlockSpec((Cout, K), lambda n, r: (0, 0)),
            pl.BlockSpec((Cout, 1), lambda n, r: (0, 0)),
        ]
        operands = (x_flat, x_flat, w2, b2)

    out_flat = pl.pallas_call(
        kern,
        out_shape=jax.ShapeDtypeStruct((N, Cout, Hout_pad * P), x.dtype),
        grid=(N, R),
        in_specs=in_specs,
        out_specs=pl.BlockSpec((1, Cout, M), lambda n, r: (n, 0, r)),
        compiler_params=pltpu.CompilerParams(
            dimension_semantics=("parallel", "parallel")),
    )(*operands)

    # free reshape + cheap fringe crop; result is already NCHW (no transpose needed)
    return out_flat.reshape(N, Cout, Hout_pad, P)[:, :, :Hout, :Wout]


class ConvTranspose2d:
    """Mirror of the torch ConvTranspose2d ('same'-padding transposed-conv forward)."""

    def __init__(self, in_channels, out_channels, kernel_size, stride=1, padding=0,
                 dilation=1, groups=1, bias=True, *, key):
        self.in_channels = in_channels
        self.out_channels = out_channels
        self.kernel_size = _pair(kernel_size)
        self.stride = _pair(stride)
        self.padding = _pair(padding)
        self.dilation = _pair(dilation)
        self.groups = groups

        # deterministic init, same distribution as torch's reset_parameters()
        n = in_channels
        for k in self.kernel_size:
            n *= k
        stdv = 1.0 / math.sqrt(n)
        kw_key, kb_key = jax.random.split(key)
        self.weight = jax.random.uniform(
            kw_key, (in_channels, out_channels // groups, *self.kernel_size),
            minval=-stdv, maxval=stdv, dtype=jnp.float32)
        self.bias = (jax.random.uniform(kb_key, (out_channels,), minval=-stdv,
                                        maxval=stdv, dtype=jnp.float32) if bias else None)

    def __call__(self, x, *, row_tile=None, compute_dtype=None):
        return convtranspose2d_same_padding(
            x, self.weight, self.bias, stride=self.stride, padding=self.padding,
            dilation=self.dilation, groups=self.groups, row_tile=row_tile,
            compute_dtype=compute_dtype)


# --------------------------------------------------------------------------------------
# Pure-XLA reference of the same forward (independent path, for correctness checks)
# --------------------------------------------------------------------------------------
def _reference(x, weight, bias, stride, dilation):
    N, Cin, H, W = x.shape
    kH, kW = int(weight.shape[2]), int(weight.shape[3])
    s_h, s_w = stride
    d_h, d_w = dilation
    out_rows = (H + s_h - 1) // s_h
    padding_rows = max(0, (out_rows - 1) * s_h + (kH - 1) * d_h + 1 - H)
    rows_odd = (padding_rows % 2) != 0
    cols_odd = rows_odd
    if rows_odd or cols_odd:
        x = jnp.pad(x, ((0, 0), (0, 0), (0, int(rows_odd)), (0, int(cols_odd))))
    p_h = p_w = padding_rows // 2
    w_conv = jnp.transpose(weight[:, :, ::-1, ::-1], (1, 0, 2, 3))   # OIHW
    y = lax.conv_general_dilated(
        x, w_conv, window_strides=(1, 1),
        padding=[(d_h * (kH - 1) - p_h,) * 2, (d_w * (kW - 1) - p_w,) * 2],
        lhs_dilation=(s_h, s_w), rhs_dilation=(d_h, d_w),
        dimension_numbers=("NCHW", "OIHW", "NCHW"))
    if bias is not None:
        y = y + bias[None, :, None, None]
    return y


if __name__ == "__main__":
    key = jax.random.PRNGKey(0)
    k_x, k_m1, k_m2, k_x3 = jax.random.split(key, 4)

    x = jax.random.normal(k_x, (2, 4, 16, 16), dtype=jnp.float32)   # NCHW, like torch

    # 1) default config: stride=1, kernel 3x3 -> "same" spatial output
    mod1 = ConvTranspose2d(4, 8, kernel_size=3, stride=1, bias=True, key=k_m1)
    y1 = jax.block_until_ready(mod1(x))
    r1 = _reference(x, mod1.weight, mod1.bias, mod1.stride, mod1.dilation)
    assert y1.shape == (2, 8, 16, 16)
    assert jnp.allclose(y1, r1, atol=1e-3, rtol=1e-3)

    # 2) upsampling config: stride=2 (zero-insertion + odd-padding path)
    mod2 = ConvTranspose2d(4, 8, kernel_size=3, stride=2, bias=True, key=k_m2)
    y2 = jax.block_until_ready(mod2(x))
    r2 = _reference(x, mod2.weight, mod2.bias, mod2.stride, mod2.dilation)
    assert y2.shape == r2.shape
    assert jnp.allclose(y2, r2, atol=1e-3, rtol=1e-3)

    # 3) row-band-tiled path (grid = (N=1, R=2), both axes parallel)
    x3 = jax.random.normal(k_x3, (1, 4, 32, 32), dtype=jnp.float32)
    y3 = jax.block_until_ready(
        convtranspose2d_same_padding(
            x3, mod1.weight, mod1.bias, stride=mod1.stride, padding=mod1.padding,
            dilation=mod1.dilation, groups=1, row_tile=16))
    r3 = _reference(x3, mod1.weight, mod1.bias, mod1.stride, mod1.dilation)
    assert y3.shape == r3.shape
    assert jnp.allclose(y3, r3, atol=1e-3, rtol=1e-3)

    # 4) bf16 MXU operands with f32 accumulation (relaxed tolerance)
    y4 = jax.block_until_ready(
        convtranspose2d_same_padding(
            x, mod1.weight, mod1.bias, stride=mod1.stride, padding=mod1.padding,
            dilation=mod1.dilation, groups=1, compute_dtype=jnp.bfloat16))
    assert jnp.allclose(y4, r1, atol=5e-2, rtol=5e-2)

    print("KERNEL_OK")
</pallas_src>

<mosaic_0001>
module attributes {stable_mosaic.version = 11 : i64} {
  func.func @_convt_kernel_single(%arg0: i32, %arg1: i32, %arg2: memref<1x4x342xf32, #tpu.memory_space<vmem>>, %arg3: memref<8x36xf32, #tpu.memory_space<vmem>>, %arg4: memref<8x1xf32, #tpu.memory_space<vmem>>, %arg5: memref<1x8x288xf32, #tpu.memory_space<vmem>>) attributes {dimension_semantics = [#tpu.dimension_semantics<parallel>, #tpu.dimension_semantics<parallel>], iteration_bounds = array<i64: 2, 1>, scalar_prefetch = 0 : i64, scratch_operands = 0 : i64, tpu.core_type = #tpu.core_type<tc>, window_params = [{transform_indices = @transform_0, window_bounds = array<i64: 1, 4, 342>}, {pipeline_mode = #tpu.pipeline_mode<synchronous>, transform_indices = @transform_1, window_bounds = array<i64: 8, 36>}, {pipeline_mode = #tpu.pipeline_mode<synchronous>, transform_indices = @transform_2, window_bounds = array<i64: 8, 1>}, {transform_indices = @transform_3, window_bounds = array<i64: 1, 8, 288>}]} {
    %c0 = arith.constant 0 : index
    %c0_0 = arith.constant 0 : index
    %c0_1 = arith.constant 0 : index
    %0 = vector.load %arg2[%c0, %c0_0, %c0_1] : memref<1x4x342xf32, #tpu.memory_space<vmem>>, vector<1x4x288xf32>
    %1 = vector.shape_cast %0 : vector<1x4x288xf32> to vector<4x288xf32>
    %c0_2 = arith.constant 0 : index
    %c0_3 = arith.constant 0 : index
    %c1 = arith.constant 1 : index
    %2 = vector.load %arg2[%c0_2, %c0_3, %c1] : memref<1x4x342xf32, #tpu.memory_space<vmem>>, vector<1x4x288xf32>
    %3 = vector.shape_cast %2 : vector<1x4x288xf32> to vector<4x288xf32>
    %c0_4 = arith.constant 0 : index
    %c0_5 = arith.constant 0 : index
    %c2 = arith.constant 2 : index
    %4 = vector.load %arg2[%c0_4, %c0_5, %c2] : memref<1x4x342xf32, #tpu.memory_space<vmem>>, vector<1x4x288xf32>
    %5 = vector.shape_cast %4 : vector<1x4x288xf32> to vector<4x288xf32>
    %c0_6 = arith.constant 0 : index
    %c0_7 = arith.constant 0 : index
    %c18 = arith.constant 18 : index
    %6 = vector.load %arg2[%c0_6, %c0_7, %c18] : memref<1x4x342xf32, #tpu.memory_space<vmem>>, vector<1x4x288xf32>
    %7 = vector.shape_cast %6 : vector<1x4x288xf32> to vector<4x288xf32>
    %c0_8 = arith.constant 0 : index
    %c0_9 = arith.constant 0 : index
    %c19 = arith.constant 19 : index
    %8 = vector.load %arg2[%c0_8, %c0_9, %c19] : memref<1x4x342xf32, #tpu.memory_space<vmem>>, vector<1x4x288xf32>
    %9 = vector.shape_cast %8 : vector<1x4x288xf32> to vector<4x288xf32>
    %c0_10 = arith.constant 0 : index
    %c0_11 = arith.constant 0 : index
    %c20 = arith.constant 20 : index
    %10 = vector.load %arg2[%c0_10, %c0_11, %c20] : memref<1x4x342xf32, #tpu.memory_space<vmem>>, vector<1x4x288xf32>
    %11 = vector.shape_cast %10 : vector<1x4x288xf32> to vector<4x288xf32>
    %c0_12 = arith.constant 0 : index
    %c0_13 = arith.constant 0 : index
    %c36 = arith.constant 36 : index
    %12 = vector.load %arg2[%c0_12, %c0_13, %c36] : memref<1x4x342xf32, #tpu.memory_space<vmem>>, vector<1x4x288xf32>
    %13 = vector.shape_cast %12 : vector<1x4x288xf32> to vector<4x288xf32>
    %c0_14 = arith.constant 0 : index
    %c0_15 = arith.constant 0 : index
    %c37 = arith.constant 37 : index
    %14 = vector.load %arg2[%c0_14, %c0_15, %c37] : memref<1x4x342xf32, #tpu.memory_space<vmem>>, vector<1x4x288xf32>
    %15 = vector.shape_cast %14 : vector<1x4x288xf32> to vector<4x288xf32>
    %c0_16 = arith.constant 0 : index
    %c0_17 = arith.constant 0 : index
    %c38 = arith.constant 38 : index
    %16 = vector.load %arg2[%c0_16, %c0_17, %c38] : memref<1x4x342xf32, #tpu.memory_space<vmem>>, vector<1x4x288xf32>
    %17 = vector.shape_cast %16 : vector<1x4x288xf32> to vector<4x288xf32>
    %18 = tpu.concatenate %1, %3, %5, %7, %9, %11, %13, %15, %17 in 0 : vector<4x288xf32>, vector<4x288xf32>, vector<4x288xf32>, vector<4x288xf32>, vector<4x288xf32>, vector<4x288xf32>, vector<4x288xf32>, vector<4x288xf32>, vector<4x288xf32> -> vector<36x288xf32>
    %c0_18 = arith.constant 0 : index
    %c0_19 = arith.constant 0 : index
    %19 = vector.load %arg3[%c0_18, %c0_19] : memref<8x36xf32, #tpu.memory_space<vmem>>, vector<8x36xf32>
    %cst = arith.constant dense<0.000000e+00> : vector<8x288xf32>
    %20 = tpu.matmul %19, %18, %cst {dimension_numbers = #tpu.dot_dimension_numbers<[1], [0], [0], [1], [0, 0, 1, 1], [], []>} : vector<8x36xf32>, vector<36x288xf32>, vector<8x288xf32> -> vector<8x288xf32>
    %c0_20 = arith.constant 0 : index
    %c0_21 = arith.constant 0 : index
    %21 = vector.load %arg4[%c0_20, %c0_21] : memref<8x1xf32, #tpu.memory_space<vmem>>, vector<8x1xf32>
    %22 = vector.broadcast %21 : vector<8x1xf32> to vector<8x288xf32>
    %23 = arith.addf %20, %22 : vector<8x288xf32>
    %c0_22 = arith.constant 0 : index
    %c0_23 = arith.constant 0 : index
    %c0_24 = arith.constant 0 : index
    %24 = vector.load %arg5[%c0_22, %c0_23, %c0_24] : memref<1x8x288xf32, #tpu.memory_space<vmem>>, vector<1x8x288xf32>
    %25 = vector.shape_cast %24 : vector<1x8x288xf32> to vector<8x288xf32>
    %26 = vector.shape_cast %23 : vector<8x288xf32> to vector<1x8x288xf32>
    tpu.vector_store %arg5[%c0_22, %c0_23, %c0_24], %26 {strides = array<i32>} : memref<1x8x288xf32, #tpu.memory_space<vmem>>, vector<1x8x288xf32>,
    return
  }
  func.func @transform_0(%arg0: i32, %arg1: i32) -> (i32, i32, i32) {
    %c0_i32 = arith.constant 0 : i32
    %c0_i32_0 = arith.constant 0 : i32
    %c0_i32_1 = arith.constant 0 : i32
    return %arg0, %c0_i32, %c0_i32_0 : i32, i32, i32
  }
  func.func @transform_1(%arg0: i32, %arg1: i32) -> (i32, i32) {
    %c0_i32 = arith.constant 0 : i32
    %c0_i32_0 = arith.constant 0 : i32
    %c0_i32_1 = arith.constant 0 : i32
    return %c0_i32, %c0_i32_0 : i32, i32
  }
  func.func @transform_2(%arg0: i32, %arg1: i32) -> (i32, i32) {
    %c0_i32 = arith.constant 0 : i32
    %c0_i32_0 = arith.constant 0 : i32
    %c0_i32_1 = arith.constant 0 : i32
    return %c0_i32, %c0_i32_0 : i32, i32
  }
  func.func @transform_3(%arg0: i32, %arg1: i32) -> (i32, i32, i32) {
    %c0_i32 = arith.constant 0 : i32
    %c0_i32_0 = arith.constant 0 : i32
    return %arg0, %c0_i32, %arg1 : i32, i32, i32
  }
}

</mosaic_0001>

<bundles_post_ra>
// kernel: convtranspose2d_same_padding.1
= control target key start
LH: loop header
LB: loop body
LE: loop exit
PB: predicated region body
PF: predicated region fallthrough
CT: control target
= control target key end

     0   :  { %s732_s12 = smov 0   ;;  %s734_s13 = smov 0   ;;  %s815_s0 = inlined_call_operand.vmem [shape: f32[2,4,342], index: 0, kind: input, shape index: {}]   ;;  %s816_s1 = inlined_call_operand.vmem [shape: f32[8,36], index: 1, kind: input, shape index: {}]   ;;  %s817_s2 = inlined_call_operand.vmem [shape: f32[8,1], index: 2, kind: input, shape index: {}]   ;;  %s818_s3 = inlined_call_operand.vmem [shape: f32[2,8,288], index: 3, kind: output, shape index: {}]  }
   0x1   :  { %s736_s14 = smov 0  }
   0x2 LB: > { %s25_s15 = sadd.s32 1, %s694_s13  ;;  %p555_p0 = scmp.ge.s32.totalorder %s698_s14, 1  ;;  %s698_s14 = sphi %s736_s14, %s13_s14   ;;  %s694_s13 = sphi %s734_s13, %s820_s13   ;;  %s690_s12 = sphi %s732_s12, %s819_s12  }
   0x3   : > { %p27_p1 = scmp.ge.s32.totalorder %s25_s15, 2  ;;  %p151_p2 = scmp.lt.s32.totalorder %s698_s14, 3 }
   0x5   : > { %s822_s15 = smov (%p27_p1, %s25_s15), 0  ;;  %p152_p3 = pnand %p555_p0, %p151_p2 }
   0x6   : > { %p179_p4 = scmp.lt.s32.totalorder (!%p152_p3), %s690_s12, 1  ;;  %v700_v2 = vmov (!%p152_p3), 0.0|0.0   ;;  %s701_s20 = smov (!%p152_p3), 126   ;;  %v708_v8 = vmov (!%p152_p3), 0.0   ;;  %vm709_vm0 = vmmov (!%p152_p3), 0   ;;  %v710_v9 = vmov (!%p152_p3), 0  }
   0x7   : > { %155 = sbr.rel (%p152_p3) target bundleno = 387 (0x183), region = 32  ;;  %592 = vmatprep.subr.bf16.mxu1 (!%p152_p3), %v700_v2  ;;  %s702_s21 = smov (!%p152_p3), 110   ;;  %389 = vmatprep.mubr.f32.mxu0 (!%p152_p3), %v708_v8  ;;  %v309_v10 = vld [vmem:[%s817_s2] sm:$0xff] (!%p152_p3)  ;;  %vm208_vm1 = vcmask (!%p152_p3), 1039360   ;;  %vm295_vm2 = vcmask (!%p152_p3), 1043456   ;;  %vm232_vm3 = vcmask (!%p152_p3), 900096  }
   0x8   : > { %s703_s22 = smov (!%p152_p3), 127   ;;  %s704_s23 = smov (!%p152_p3), 109   ;;  %581 = vmatprep.mubr.msk.f32.mxu1 (!%p152_p3), %vm709_vm0, %v708_v8  ;;  %671 = vset.pattern.permute.xlu1 (!%p152_p3), %v710_v9  ;;  %vm220_vm4 = vcmask (!%p152_p3), 1031168   ;;  %vm244_vm5 = vcmask (!%p152_p3), 891904   ;;  %vm256_vm6 = vcmask (!%p152_p3), 883712   ;;  %vm268_vm7 = vcmask (!%p152_p3), 752640  }
   0x9   : > { %s705_s24 = smov (!%p152_p3), 108   ;;  %s706_s25 = smov (!%p152_p3), 92   ;;  %672 = vset.pattern.permute.xlu0 (!%p152_p3), %v710_v9  ;;  %vm280_vm8 = vcmask (!%p152_p3), 744448   ;;  %vm292_vm9 = vcmask (!%p152_p3), 736256   ;;  %v308_v9 = vld [vmem:[%s816_s1] sm:$0xff] (!%p152_p3)  ;;  %vm315_vm10 = vcmask (!%p152_p3), 293888  }
   0xa   : > { %s707_s26 = smov (!%p152_p3), 91   ;;  %s711_s27 = smov (!%p152_p3), 90   ;;  %vm468_vm11 = vcmask (!%p152_p3), 261120  }
   0xe   : > { %s824_s12 = smov (!%p179_p4, %s690_s12), 1 }
   0xf   : > { %s598_s16 = smul.u32 12, %s824_s12 }
  0x10   : > { %s599_s5 = smul.u32 24, %s824_s12 }
  0x11   : > { %s183_s19 = scalar_lea.vmem %s815_s0, %s598_s16 }
  0x12   : > { %v756_v0 = vld [vmem:[%s183_s19] sm:$0xff]  ;;  %v195_v1 = vld [vmem:[%s183_s19 + $0x8] sm:$0xf]  ;;  %s192_s8 = scalar_lea.vmem %s818_s3, %s599_s5 }
  0x13   : > { %214 = vrot.lane.b32.xlu0 %v756_v0, %s701_s20  ;;  %v201_v3 = vcombine.low %v195_v1, %v195_v1  ;;  %v198_v4 = vcombine.high %v756_v0, %v756_v0  ;;  %v200_v6 = vcombine.low %v756_v0, %v756_v0 }
  0x15   : > { %v646_v5 = vpack.i.bf16 %v201_v3, %v756_v0  ;;  %v641_v7 = vpack.i.bf16 %v195_v1, %v198_v4 }
  0x17   : > { %647 = vrot.lane.b32.xlu1 %v646_v5, %s702_s21  ;;  %637 = vrot.lane.b32.xlu0 %v646_v5, %s703_s22 }
  0x1b   : > { %202 = vrot.lane.b32.xlu1 %v200_v6, %s703_s22  ;;  %642 = vrot.lane.b32.xlu0 %v641_v7, %s701_s20 }
  0x1f   : > { %226 = vrot.lane.b32.xlu1 %v200_v6, %s702_s21  ;;  %652 = vrot.lane.b32.xlu0 %v641_v7, %s704_s23 }
  0x23   : > { %657 = vrot.lane.b32.xlu1 %v646_v5, %s705_s24  ;;  %662 = vrot.lane.b32.xlu0 %v641_v7, %s706_s25 }
  0x27   : > { %667 = vrot.lane.b32.xlu1 %v646_v5, %s707_s26  ;;  %238 = vrot.lane.b32.xlu0 %v756_v0, %s704_s23 }
  0x2b   : > { %250 = vrot.lane.b32.xlu1 %v200_v6, %s705_s24  ;;  %262 = vrot.lane.b32.xlu0 %v756_v0, %s706_s25 }
  0x2f   : > { %274 = vrot.lane.b32.xlu1 %v200_v6, %s707_s26  ;;  %288 = vrot.lane.b32.xlu0 %v198_v4, %s711_s27 }
  0x33   : > { %290 = vrot.lane.b32.xlu1 %v195_v1, %s711_s27  ;;  %286 = vrot.lane.b32.xlu0 %v756_v0, %s711_s27 }
  0x37   : > { %312 = vperm.xlu1 %671, %v309_v10  }
  0x85   : > { %v215_v11 = vpop.permute.xlu0 %214 }
  0x89   : > { %v648_v12 = vpop.permute.xlu1 %647  ;;  %v638_v13 = vpop.permute.xlu0 %637 }
  0x8a   : > { %v640_v14 = vunpack.i.h.bf16 %v638_v13  ;;  %v639_v15 = vunpack.i.l.bf16 %v638_v13  ;;  %v650_v16 = vunpack.i.h.bf16 %v648_v12  ;;  %v649_v17 = vunpack.i.l.bf16 %v648_v12 }
  0x8c   : > { %v210_v18 = vsel %vm208_vm1, %v639_v15, %v640_v14  ;;  %v298_v23 = vsel %vm295_vm2, %v195_v1, %v640_v14  ;;  %v234_v28 = vsel %vm232_vm3, %v649_v17, %v650_v16 }
  0x8d   : > { %v203_v19 = vpop.permute.xlu1 %202  ;;  %v643_v20 = vpop.permute.xlu0 %642  ;;  %v297_v24 = vsel %vm295_vm2, %v198_v4, %v210_v18 }
  0x8e   : > { %v645_v21 = vunpack.i.h.bf16 %v643_v20  ;;  %v644_v22 = vunpack.i.l.bf16 %v643_v20  ;;  %v209_v25 = vsel %vm208_vm1, %v203_v19, %v639_v15 }
  0x8f   : > { %v296_v36 = vsel %vm295_vm2, %v756_v0, %v209_v25 }
  0x90   : > { %v301_v26 = vsel %vm295_vm2, %v645_v21, %v650_v16  ;;  %v222_v27 = vsel %vm220_vm4, %v644_v22, %v645_v21  ;;  %v221_v35 = vsel %vm220_vm4, %v215_v11, %v644_v22 }
  0x91   : > { %v227_v29 = vpop.permute.xlu1 %226  ;;  %v653_v30 = vpop.permute.xlu0 %652  ;;  %v593_v31 = vpack.c.bf16 %v301_v26, %v298_v23  ;;  %v300_v32 = vsel %vm295_vm2, %v222_v27, %v234_v28 }
  0x92   : > { %v233_v33 = vsel %vm232_vm3, %v227_v29, %v649_v17  ;;  %v584_v34 = vpack.c.bf16 %v300_v32, %v297_v24  ;;  %v655_v39 = vunpack.i.h.bf16 %v653_v30  ;;  %v654_v40 = vunpack.i.l.bf16 %v653_v30 }
  0x93   : > { %594 = vmatpush3.bf16.msra.mxu1 %v593_v31  ;;  %v299_v37 = vsel %vm295_vm2, %v221_v35, %v233_v33 }
  0x94   : > { %585 = vmatprep.subr.bf16.mxu0 %v584_v34  ;;  %v586_v38 = vpack.c.bf16 %v299_v37, %v296_v36  ;;  %595 = vmatprep.subr.bf16.mxu1 %v700_v2  ;;  %v246_v49 = vsel %vm244_vm5, %v654_v40, %v655_v39 }
  0x95   : > { %v658_v41 = vpop.permute.xlu1 %657  ;;  %v663_v42 = vpop.permute.xlu0 %662 }
  0x96   : > { %v660_v43 = vunpack.i.h.bf16 %v658_v41  ;;  %v659_v44 = vunpack.i.l.bf16 %v658_v41  ;;  %v665_v45 = vunpack.i.h.bf16 %v663_v42  ;;  %v664_v46 = vunpack.i.l.bf16 %v663_v42  ;;  %587 = vmatpush1.bf16.msra.mxu0 %v586_v38 }
  0x98   : > { %v258_v52 = vsel %vm256_vm6, %v659_v44, %v660_v43  ;;  %v270_v53 = vsel %vm268_vm7, %v664_v46, %v665_v45  ;;  %v304_v55 = vsel %vm295_vm2, %v655_v39, %v660_v43 }
  0x99   : > { %v668_v47 = vpop.permute.xlu1 %667  ;;  %v239_v48 = vpop.permute.xlu0 %238  ;;  %v303_v60 = vsel %vm295_vm2, %v246_v49, %v258_v52 }
  0x9a   : > { %v670_v50 = vunpack.i.h.bf16 %v668_v47  ;;  %v669_v51 = vunpack.i.l.bf16 %v668_v47  ;;  %v245_v2 = vsel %vm244_vm5, %v239_v48, %v654_v40 }
  0x9c   : > { %v282_v54 = vsel %vm280_vm8, %v669_v51, %v670_v50  ;;  %v307_v56 = vsel %vm295_vm2, %v665_v45, %v670_v50 }
  0x9d   : > { %v251_v57 = vpop.permute.xlu1 %250  ;;  %v263_v58 = vpop.permute.xlu0 %262  ;;  %v596_v59 = vpack.c.bf16 %v307_v56, %v304_v55  ;;  %v306_v61 = vsel %vm295_vm2, %v270_v53, %v282_v54 }
  0x9e   : > { %v588_v62 = vpack.c.bf16 %v306_v61, %v303_v60  ;;  %v257_v63 = vsel %vm256_vm6, %v251_v57, %v659_v44  ;;  %v269_v3 = vsel %vm268_vm7, %v263_v58, %v664_v46 }
  0x9f   : > { %597 = vmatpush3.bf16.msra.mxu1 %v596_v59  ;;  %v302_v5 = vsel %vm295_vm2, %v245_v2, %v257_v63 }
  0xa0   : > { %589 = vmatprep.subr.bf16.mxu0 %v588_v62  ;;  %579 = vmatprep.subr.mxu1 %v708_v8 }
  0xa1   : > { %v275_v0 = vpop.permute.xlu1 %274  ;;  %v289_v1 = vpop.permute.xlu0 %288 }
  0xa2   : > { %v281_v4 = vsel %vm280_vm8, %v275_v0, %v669_v51 }
  0xa3   : > { %v305_v6 = vsel %vm295_vm2, %v269_v3, %v281_v4 }
  0xa4   : > { %v590_v7 = vpack.c.bf16 %v305_v6, %v302_v5 }
  0xa5   : > { %v291_v8 = vpop.permute.xlu1 %290  ;;  %v287_v11 = vpop.permute.xlu0 %286 }
  0xa6   : > { %v294_v10 = vsel %vm292_vm9, %v289_v1, %v291_v8  ;;  %591 = vmatpush1.bf16.msra.mxu0 %v590_v7  ;;  %580 = vmatpush3.msk.msra.mxu1 %vm295_vm2, %v291_v8  ;;  %v293_v12 = vsel %vm292_vm9, %v287_v11, %v289_v1 }
  0xa7   : > { %558 = vmatprep.subr.msk.mxu0 %vm295_vm2, %v294_v10  ;;  %582 = vmatmul.mubr.msk.f32.vlgmr.msra.gmra.mrb[0].mxu1 %vm315_vm10, %v308_v9 }
  0xaa   : > { %559 = vmatpush1.msk.msra.mxu0 %vm295_vm2, %v293_v12 }
  0xab   : > { %560 = vmatmul.mubr.msk.f32.vlgmr.msra.gmra.mrb[0].mxu0 %vm315_vm10, %v308_v9 }
  0xb6   : > { %v313_v13 = vpop.permute.xlu1 %312 }
 0x17a   : > { %v462_v14 = vpop.f32.mrb[0].mxu1 }
 0x17b   : > { %v463_v15 = vadd.f32 %v462_v14, %v313_v13  ;;  %v583_v16 = vpop.f32.mrb[1].mxu1 }
 0x17d   : > { %469 = vst.msk [vmem:[%s192_s8 + $0x10] sm:$0xff] %vm468_vm11, %v463_v15 }
 0x17e   : > { %v391_v17 = vpop.f32.mrb[0].mxu0 }
 0x17f   : > { %v392_v18 = vadd.f32 %v391_v17, %v313_v13  ;;  %v393_v19 = vpop.f32.mrb[1].mxu0 }
 0x180   : > { %v394_v20 = vadd.f32 %v393_v19, %v313_v13 }
 0x181   : > { %466 = vst [vmem:[%s192_s8] sm:$0xff] %v392_v18 }
 0x182   : > { %467 = vst [vmem:[%s192_s8 + $0x8] sm:$0xff] %v394_v20 }
 0x183 PF: > { %s13_s14 = sadd.s32 1, %s698_s14   ;;  %s819_s12 = smov %s694_s13 }
 0x184   : > { %p10_p5 = scmp.ge.s32.totalorder %s13_s14, 4   ;;  %s820_s13 = smov %s822_s15 }
 0x186   :  { %12 = sbr.rel (!%p10_p5) target bundleno = 2 (0x2), region = 62 }

</bundles_post_ra>
